<compile_context>
chip_gen: v7x
topology: tpu7x:2x2x1
jax: 0.10.0
libtpu: 0.0.40
codegen_flags: <defaults>
</compile_context>

<pallas_src>
import functools

import jax
import jax.numpy as jnp
from jax.experimental import pallas as pl
from jax.experimental.pallas import tpu as pltpu


def _gcn_kernel(x_ref, adj_ref, w_ref, b_ref, scale_ref, shift_ref, o_ref, *,
                use_bn, bb, n, dout, aggregate_first):
    # x_ref: (bb, N, Din)  adj_ref: (bb, N, N) [bf16]  w_ref: (Din, Dout)  b_ref: (1, Dout)
    # scale_ref/shift_ref: (1, N*Dout)  o_ref: (bb, N*Dout)
    adj = adj_ref[...].astype(jnp.float32)     # upcast 0/1 mask; keep f32 accumulation

    if not aggregate_first:
        # Dout <= Din: fused linear first -> one large-M matmul, then per-graph aggregation.
        x2d = x_ref[...].reshape(bb * n, -1)                       # (bb*N, Din)
        h = jnp.dot(x2d, w_ref[...],
                    preferred_element_type=jnp.float32) + b_ref[...]
        h = h.reshape(bb, n, dout)
        y = jnp.einsum('bnm,bmd->bnd', adj, h,
                       preferred_element_type=jnp.float32)          # (bb, N, Dout)
    else:
        # Dout > Din: contract the O(N^2) matmul over the smaller feature dim.
        # adj @ (xW + b) == (adj @ x) @ W + rowsum(adj) * b
        z = jnp.einsum('bnm,bmd->bnd', adj, x_ref[...].astype(jnp.float32),
                       preferred_element_type=jnp.float32)          # (bb, N, Din)
        y = jnp.dot(z.reshape(bb * n, -1), w_ref[...],
                    preferred_element_type=jnp.float32).reshape(bb, n, dout)
        y = y + jnp.sum(adj, axis=-1, keepdims=True) * b_ref[...][None, :, :]

    # Flatten to a lane-dense slab for the epilogue + store.
    y = y.reshape(bb, n * dout)
    if use_bn:
        y = y * scale_ref[...] + shift_ref[...]
    o_ref[...] = jnp.maximum(y, 0.0).astype(o_ref.dtype)


def gcn_layer(x, adj, w, b, scale, shift, *, use_bn=True, bb=None):
    B, N, Din = x.shape
    Dout = w.shape[1]

    # --- choose graphs-per-block so the fused linear has >=128 rows, amortizing grid overhead.
    if bb is None:
        bb = max(1, pl.cdiv(128, N))
        if bb < B:
            bb = min(pl.cdiv(bb, 8) * 8, B)   # keep the output block sublane-aligned
    bb = min(bb, B)
    B_pad = pl.cdiv(B, bb) * bb

    # --- pad batch to a multiple of bb (padded graphs are all-zero; sliced off at the end).
    if B_pad != B:
        pad = B_pad - B
        x = jnp.pad(x, ((0, pad), (0, 0), (0, 0)))
        adj = jnp.pad(adj, ((0, pad), (0, 0), (0, 0)))

    # --- compress adj to bf16 (0/1 exact) to halve the dominant B*N^2 HBM traffic.
    adj_c = adj.astype(jnp.bfloat16)

    # --- pre-broadcast BN affine to a lane-dense (1, N*Dout) vector.
    scale_flat = jnp.broadcast_to(scale.reshape(N, 1), (N, Dout)).reshape(1, N * Dout)
    shift_flat = jnp.broadcast_to(shift.reshape(N, 1), (N, Dout)).reshape(1, N * Dout)

    aggregate_first = Dout > Din
    kernel = functools.partial(_gcn_kernel, use_bn=use_bn, bb=bb, n=N, dout=Dout,
                               aggregate_first=aggregate_first)

    out_flat = pl.pallas_call(
        kernel,
        out_shape=jax.ShapeDtypeStruct((B_pad, N * Dout), x.dtype),
        grid_spec=pltpu.PrefetchScalarGridSpec(
            num_scalar_prefetch=0,
            grid=(B_pad // bb,),
            in_specs=[
                pl.BlockSpec((bb, N, Din), lambda bi: (bi, 0, 0)),    # x
                pl.BlockSpec((bb, N, N), lambda bi: (bi, 0, 0)),      # adj (bf16)
                pl.BlockSpec((Din, Dout), lambda bi: (0, 0)),         # W   (constant index_map -> no re-DMA)
                pl.BlockSpec((1, Dout), lambda bi: (0, 0)),           # bias
                pl.BlockSpec((1, N * Dout), lambda bi: (0, 0)),       # bn scale (lane-dense)
                pl.BlockSpec((1, N * Dout), lambda bi: (0, 0)),       # bn shift (lane-dense)
            ],
            out_specs=pl.BlockSpec((bb, N * Dout), lambda bi: (bi, 0)),
        ),
        # Batch-block axis is independent -> parallel (megacore sharding on v7x).
        # Working set per step is tiny here; for large N, add an adj row-tile grid axis and/or
        # set vmem_limit_bytes (v7x has only 64 MiB VMEM).
        compiler_params=pltpu.CompilerParams(
            dimension_semantics=("parallel",)),
    )(x, adj_c, w, b, scale_flat, shift_flat)

    return out_flat.reshape(B_pad, N, Dout)[:B]


def gcn_reference(x, adj, w, b, scale, shift, *, use_bn=True):
    h = jnp.einsum("bnd,de->bne", x, w) + b[0]
    y = jnp.einsum("bnm,bme->bne", adj, h)
    if use_bn:
        y = y * scale[None, :, :] + shift[None, :, :]
    return jnp.maximum(y, 0.0)


if __name__ == "__main__":
    # Small, module-consistent shapes: batch=2, n_atom=8, in_dim=32, out_dim=16.
    B, N, Din, Dout = 2, 8, 32, 16
    use_bn = True

    key = jax.random.PRNGKey(0)
    kx, kadj, kw, kb, kg, kbeta, kmean, kvar = jax.random.split(key, 8)

    x = jax.random.normal(kx, (B, N, Din), dtype=jnp.float32)
    adj = (jax.random.uniform(kadj, (B, N, N), dtype=jnp.float32) > 0.5).astype(jnp.float32)

    # Deterministic parameter init (synthetic, not a checkpoint load).
    w = jax.random.normal(kw, (Din, Dout), dtype=jnp.float32) * (1.0 / jnp.sqrt(Din))
    b = jax.random.normal(kb, (1, Dout), dtype=jnp.float32) * 0.1

    # BatchNorm1d(n_atom) eval-mode params folded into per-atom scale/shift.
    eps = 1e-5
    gamma = 1.0 + 0.1 * jax.random.normal(kg, (N,), dtype=jnp.float32)
    beta = 0.1 * jax.random.normal(kbeta, (N,), dtype=jnp.float32)
    running_mean = 0.1 * jax.random.normal(kmean, (N,), dtype=jnp.float32)
    running_var = 1.0 + 0.1 * jax.random.uniform(kvar, (N,), dtype=jnp.float32)
    bn_scale = (gamma / jnp.sqrt(running_var + eps)).reshape(N, 1)
    bn_shift = (beta - running_mean * gamma / jnp.sqrt(running_var + eps)).reshape(N, 1)

    out = gcn_layer(x, adj, w, b, bn_scale, bn_shift, use_bn=use_bn)
    out = jax.block_until_ready(out)

    ref = gcn_reference(x, adj, w, b, bn_scale, bn_shift, use_bn=use_bn)
    assert out.shape == (B, N, Dout)
    assert jnp.allclose(out, ref, atol=1e-4, rtol=1e-4), "mismatch vs reference"

    print("KERNEL_OK")
</pallas_src>

<mosaic_0001>
module attributes {stable_mosaic.version = 11 : i64} {
  func.func @_gcn_kernel(%arg0: i32, %arg1: memref<2x8x32xf32, #tpu.memory_space<vmem>>, %arg2: memref<2x8x8xbf16, #tpu.memory_space<vmem>>, %arg3: memref<32x16xf32, #tpu.memory_space<vmem>>, %arg4: memref<1x16xf32, #tpu.memory_space<vmem>>, %arg5: memref<1x128xf32, #tpu.memory_space<vmem>>, %arg6: memref<1x128xf32, #tpu.memory_space<vmem>>, %arg7: memref<2x128xf32, #tpu.memory_space<vmem>>) attributes {dimension_semantics = [#tpu.dimension_semantics<parallel>], iteration_bounds = array<i64: 1>, scalar_prefetch = 0 : i64, scratch_operands = 0 : i64, tpu.core_type = #tpu.core_type<tc>, window_params = [{transform_indices = @transform_0, window_bounds = array<i64: 2, 8, 32>}, {transform_indices = @transform_1, window_bounds = array<i64: 2, 8, 8>}, {pipeline_mode = #tpu.pipeline_mode<synchronous>, transform_indices = @transform_2, window_bounds = array<i64: 32, 16>}, {pipeline_mode = #tpu.pipeline_mode<synchronous>, transform_indices = @transform_3, window_bounds = array<i64: 1, 16>}, {pipeline_mode = #tpu.pipeline_mode<synchronous>, transform_indices = @transform_4, window_bounds = array<i64: 1, 128>}, {pipeline_mode = #tpu.pipeline_mode<synchronous>, transform_indices = @transform_5, window_bounds = array<i64: 1, 128>}, {transform_indices = @transform_6, window_bounds = array<i64: 2, 128>}]} {
    %c0 = arith.constant 0 : index
    %c0_0 = arith.constant 0 : index
    %c0_1 = arith.constant 0 : index
    %0 = vector.load %arg2[%c0, %c0_0, %c0_1] : memref<2x8x8xbf16, #tpu.memory_space<vmem>>, vector<2x8x8xbf16>
    %1 = arith.extf %0 : vector<2x8x8xbf16> to vector<2x8x8xf32>
    %c0_2 = arith.constant 0 : index
    %c0_3 = arith.constant 0 : index
    %c0_4 = arith.constant 0 : index
    %2 = vector.load %arg1[%c0_2, %c0_3, %c0_4] : memref<2x8x32xf32, #tpu.memory_space<vmem>>, vector<2x8x32xf32>
    %3 = vector.shape_cast %2 : vector<2x8x32xf32> to vector<16x32xf32>
    %c0_5 = arith.constant 0 : index
    %c0_6 = arith.constant 0 : index
    %4 = vector.load %arg3[%c0_5, %c0_6] : memref<32x16xf32, #tpu.memory_space<vmem>>, vector<32x16xf32>
    %cst = arith.constant dense<0.000000e+00> : vector<16x16xf32>
    %5 = tpu.matmul %3, %4, %cst {dimension_numbers = #tpu.dot_dimension_numbers<[1], [0], [0], [1], [0, 0, 1, 1], [], []>} : vector<16x32xf32>, vector<32x16xf32>, vector<16x16xf32> -> vector<16x16xf32>
    %c0_7 = arith.constant 0 : index
    %c0_8 = arith.constant 0 : index
    %6 = vector.load %arg4[%c0_7, %c0_8] : memref<1x16xf32, #tpu.memory_space<vmem>>, vector<1x16xf32>
    %7 = vector.broadcast %6 : vector<1x16xf32> to vector<16x16xf32>
    %8 = arith.addf %5, %7 : vector<16x16xf32>
    %9 = vector.shape_cast %8 : vector<16x16xf32> to vector<2x8x16xf32>
    "tpu.trace_start"() <{level = 10 : i32, message = "bnm,bmd->bnd"}> : () -> ()
    %cst_9 = arith.constant dense<0.000000e+00> : vector<2x8x16xf32>
    %10 = tpu.matmul %1, %9, %cst_9 {dimension_numbers = #tpu.dot_dimension_numbers<[2], [1], [1], [2], [0, 0, 0, 1, 1, 2], [0], [0]>} : vector<2x8x8xf32>, vector<2x8x16xf32>, vector<2x8x16xf32> -> vector<2x8x16xf32>
    "tpu.trace_stop"() : () -> ()
    %11 = vector.shape_cast %10 : vector<2x8x16xf32> to vector<2x128xf32>
    %c0_10 = arith.constant 0 : index
    %c0_11 = arith.constant 0 : index
    %12 = vector.load %arg5[%c0_10, %c0_11] : memref<1x128xf32, #tpu.memory_space<vmem>>, vector<1x128xf32>
    %13 = vector.broadcast %12 : vector<1x128xf32> to vector<2x128xf32>
    %14 = arith.mulf %11, %13 : vector<2x128xf32>
    %c0_12 = arith.constant 0 : index
    %c0_13 = arith.constant 0 : index
    %15 = vector.load %arg6[%c0_12, %c0_13] : memref<1x128xf32, #tpu.memory_space<vmem>>, vector<1x128xf32>
    %16 = vector.broadcast %15 : vector<1x128xf32> to vector<2x128xf32>
    %17 = arith.addf %14, %16 : vector<2x128xf32>
    %cst_14 = arith.constant 0.000000e+00 : f32
    %18 = vector.broadcast %cst_14 : f32 to vector<2x128xf32>
    %19 = arith.maximumf %17, %18 : vector<2x128xf32>
    %c0_15 = arith.constant 0 : index
    %c0_16 = arith.constant 0 : index
    %20 = vector.load %arg7[%c0_15, %c0_16] : memref<2x128xf32, #tpu.memory_space<vmem>>, vector<2x128xf32>
    tpu.vector_store %arg7[%c0_15, %c0_16], %19 {strides = array<i32>} : memref<2x128xf32, #tpu.memory_space<vmem>>, vector<2x128xf32>,
    return
  }
  func.func @transform_0(%arg0: i32) -> (i32, i32, i32) {
    %c0_i32 = arith.constant 0 : i32
    %c0_i32_0 = arith.constant 0 : i32
    %c0_i32_1 = arith.constant 0 : i32
    return %arg0, %c0_i32, %c0_i32_0 : i32, i32, i32
  }
  func.func @transform_1(%arg0: i32) -> (i32, i32, i32) {
    %c0_i32 = arith.constant 0 : i32
    %c0_i32_0 = arith.constant 0 : i32
    %c0_i32_1 = arith.constant 0 : i32
    return %arg0, %c0_i32, %c0_i32_0 : i32, i32, i32
  }
  func.func @transform_2(%arg0: i32) -> (i32, i32) {
    %c0_i32 = arith.constant 0 : i32
    %c0_i32_0 = arith.constant 0 : i32
    %c0_i32_1 = arith.constant 0 : i32
    return %c0_i32, %c0_i32_0 : i32, i32
  }
  func.func @transform_3(%arg0: i32) -> (i32, i32) {
    %c0_i32 = arith.constant 0 : i32
    %c0_i32_0 = arith.constant 0 : i32
    %c0_i32_1 = arith.constant 0 : i32
    return %c0_i32, %c0_i32_0 : i32, i32
  }
  func.func @transform_4(%arg0: i32) -> (i32, i32) {
    %c0_i32 = arith.constant 0 : i32
    %c0_i32_0 = arith.constant 0 : i32
    %c0_i32_1 = arith.constant 0 : i32
    return %c0_i32, %c0_i32_0 : i32, i32
  }
  func.func @transform_5(%arg0: i32) -> (i32, i32) {
    %c0_i32 = arith.constant 0 : i32
    %c0_i32_0 = arith.constant 0 : i32
    %c0_i32_1 = arith.constant 0 : i32
    return %c0_i32, %c0_i32_0 : i32, i32
  }
  func.func @transform_6(%arg0: i32) -> (i32, i32) {
    %c0_i32 = arith.constant 0 : i32
    %c0_i32_0 = arith.constant 0 : i32
    return %arg0, %c0_i32 : i32, i32
  }
}

</mosaic_0001>

<bundles_post_ra>
// kernel: tpu_custom_call.1
= control target key start
LH: loop header
LB: loop body
LE: loop exit
PB: predicated region body
PF: predicated region fallthrough
CT: control target
= control target key end

     0   :  { %vm41_vm0 = vcmask 261120   ;;  %s587_s0 = inlined_call_operand.vmem [shape: f32[2,8,32], index: 0, kind: input, shape index: {}]   ;;  %s588_s1 = inlined_call_operand.vmem [shape: bf16[2,8,8], index: 1, kind: input, shape index: {}]   ;;  %s589_s2 = inlined_call_operand.vmem [shape: f32[32,16], index: 2, kind: input, shape index: {}]   ;;  %s590_s3 = inlined_call_operand.vmem [shape: f32[1,16], index: 3, kind: input, shape index: {}]   ;;  %s591_s4 = inlined_call_operand.vmem [shape: f32[1,128], index: 4, kind: input, shape index: {}]   ;;  %s592_s5 = inlined_call_operand.vmem [shape: f32[1,128], index: 5, kind: input, shape index: {}]   ;;  %s593_s6 = inlined_call_operand.hbm [shape: f32[2,128], index: 6, kind: output, shape index: {}]  }
   0x1   :  { %v30_v0 = vld [vmem:[%s589_s2] sm:$0xff]  ;;  %v31_v1 = vld [vmem:[%s589_s2 + $0x8] sm:$0xff]  ;;  %v32_v2 = vld [vmem:[%s589_s2 + $0x10] sm:$0xff] }
   0x2   :  { %v451_v3 = vpack.c.bf16 %v31_v1, %v30_v0  ;;  %v33_v4 = vld [vmem:[%s589_s2 + $0x18] sm:$0xff]  ;;  %v28_v5 = vld [vmem:[%s587_s0] sm:$0xff] }
   0x3   :  { %v455_v6 = vpack.c.bf16 %v33_v4, %v32_v2  ;;  %438 = vmatprep.mubr.msk.f32.mxu0 %vm41_vm0, %v28_v5 }
   0x4   :  { %11 = vsyncpa [#allocation3], 0  ;;  %452 = vmatprep.subr.bf16.mxu0 %v451_v3  ;;  %v29_v7 = vld [vmem:[%s587_s0 + $0x8] sm:$0xff]  ;;  %v495_v8 = vmov 0.0   ;;  %vm496_vm1 = vmmov 0   ;;  %v417_v9 = vld [vmem:[%s588_s1] sm:$0xff]   ;;  %v274_v19 = vlaneseq }
   0x5   :  { %454 = vmatpush3.bf16.msra.mxu0 %v451_v3  ;;  %441 = vmatprep.subr.mxu1 %v495_v8  ;;  %v409_v10 = vld [vmem:[%s590_s3] ss:$0 sm:$0xff]  ;;  %v418_v13 = vunpack.c.l.bf16 %v417_v9  ;;  %vm123_vm2 = vcmask 64512   ;;  %v419_v16 = vunpack.c.h.bf16 %v417_v9  ;;  %v497_v17 = vmov 1983009808   ;;  %s499_s0 = smov 32  }
   0x6   :  { %456 = vmatprep.subr.bf16.mxu0 %v455_v6  ;;  %443 = vmatprep.mubr.msk.f32.mxu1 %vm496_vm1, %v495_v8  ;;  %v272_v18 = vunpack.c.l.s4 %v497_v17  ;;  %v275_v21 = vshrl.u32 %v274_v19, 7  ;;  %v498_v22 = vmov 1934713408   ;;  %s500_s1 = smov 48   ;;  %s501_s3 = smov 16   ;;  %vm364_vm3 = vcmask 130048  }
   0x7   :  { %v303_v23 = vunpack.c.l.s4 %v498_v22  ;;  %s502_s12 = smov 64   ;;  %s503_s13 = smov 80   ;;  %vm367_vm4 = vcmask 392192   ;;  %vm369_vm5 = vcmask 523264   ;;  %vm371_vm6 = vcmask 654336  }
   0x8   :  { %v273_v20 = vunpack.c.0.s8 %v272_v18  ;;  %s504_s14 = smov 96   ;;  %s505_s15 = smov 112   ;;  %vm373_vm7 = vcmask 785408   ;;  %vm375_vm8 = vcmask 916480   ;;  %v414_v61 = vld [vmem:[%s591_s4] ss:$0 sm:$0xff] }
   0x9   :  { %458 = vmatpush3.bf16.msra.mxu0 %v455_v6  ;;  %v304_v27 = vunpack.c.0.s8 %v303_v23  ;;  %v415_v0 = vld [vmem:[%s592_s5] ss:$0 sm:$0xff]  ;;  %s506_s20 = smov [#allocation2]  }
   0xa   :  { %v276_v25 = vsub.s32 %v273_v20, %v275_v21  ;;  %s401_s21 = sshll.u32 %s506_s20, 4  ;;  %s402_s21 = int_to_ptr.vmem [resolvable:$true] %s401_s21 }
   0xb   :  { %v307_v33 = vsub.s32 %v304_v27, %v275_v21  ;;  %s471_s22 = scalar_lea.vmem %s402_s21, 32  ;;  %p476_p1 = scmp.lt.s32.totalorder %s402_s21, %s402_s21 }
   0xc   :  { %439 = vmatmul.mubr.msk.f32.vlgmr.msra.gmra.mrb[0].mxu0 %vm41_vm0, %v29_v7  ;;  %p472_p0 = scmp.ne.s32.totalorder %s402_s21, %s471_s22  ;;  %p477_p2 = scmp.lt.s32.totalorder %s471_s22, %s471_s22 }
   0xe   :  { %p478_p3 = por %p477_p2, %p476_p1 }
  0x10   :  { %p479_p4 = pnand %p478_p3, %p472_p0 }
  0xdf   :  { %v440_v11 = vpop.f32.mrb[0].mxu0 }
  0xe0   :  { %v114_v12 = vpop.f32.mrb[1].mxu0  ;;  %v120_v15 = vadd.f32 %v440_v11, %v409_v10 }
  0xe1   :  { %v115_v14 = vadd.f32 %v409_v10, %v114_v12 }
  0xe3   :  { %442 = vmatpush3.msra.mxu1 %v115_v14 }
  0xe4   :  { %444 = vmatmul.mubr.msk.f32.vlgmr.msra.gmra.mrb[0].mxu1 %vm123_vm2, %v418_v13  ;;  %446 = vmatprep.subr.mxu1 %v495_v8 }
  0xe5   :  { %447 = vmatpush3.msra.mxu1 %v120_v15  ;;  %448 = vmatprep.mubr.msk.f32.mxu1 %vm496_vm1, %v495_v8 }
  0xe8   :  { %449 = vmatmul.mubr.msk.f32.vlgmr.msra.gmra.mrb[2].mxu1 %vm123_vm2, %v419_v16 }
 0x1b7   :  { %v193_v24 = vpop.f32.mrb[0].mxu1 }
 0x1b8   :  { %v445_v26 = vpop.f32.mrb[1].mxu1  ;;  %v270_v28 = vcombine.high %v193_v24, %v495_v8  ;;  %v277_v30 = vrot.slane %v193_v24, %v276_v25 }
 0x1ba   :  { %v284_v35 = vrot.slane %v270_v28, %v276_v25 }
 0x1bb   :  { %v266_v29 = vpop.f32.mrb[2].mxu1 }
 0x1bc   :  { %v285_v31 = vcombine.high %v266_v29, %v495_v8  ;;  %v292_v32 = vrot.slane %v266_v29, %v276_v25  ;;  %v450_v34 = vpop.f32.mrb[3].mxu1 }
 0x1be   :  { %v299_v36 = vrot.slane %v285_v31, %v276_v25  ;;  %v300_v37 = vcombine.low %v277_v30, %v292_v32  ;;  %v301_v38 = vcombine.high %v277_v30, %v292_v32 }
 0x1c0   :  { %v308_v39 = vrot.slane %v300_v37, %v307_v33  ;;  %v316_v40 = vcombine.low %v284_v35, %v299_v36  ;;  %v317_v41 = vcombine.high %v284_v35, %v299_v36  ;;  %v315_v42 = vrot.slane %v301_v38, %v307_v33 }
 0x1c2   :  { %341 = vrot.lane.b32.xlu0 %v315_v42, %s499_s0  ;;  %v333_v43 = vcombine.high %v315_v42, %v495_v8  ;;  %v332_v44 = vcombine.high %v308_v39, %v495_v8  ;;  %v324_v45 = vrot.slane %v316_v40, %v307_v33  ;;  %v331_v47 = vrot.slane %v317_v41, %v307_v33 }
 0x1c4   :  { %345 = vrot.lane.b32.xlu1 %v333_v43, %s500_s1  ;;  %v334_v46 = vcombine.high %v324_v45, %v495_v8  ;;  %v335_v48 = vcombine.high %v331_v47, %v495_v8 }
 0x1c6   :  { %337 = vrot.lane.b32.xlu0 %v332_v44, %s501_s3 }
 0x1c8   :  { %349 = vrot.lane.b32.xlu1 %v324_v45, %s502_s12 }
 0x1ca   :  { %353 = vrot.lane.b32.xlu0 %v334_v46, %s503_s13 }
 0x1cc   :  { %357 = vrot.lane.b32.xlu1 %v331_v47, %s504_s14 }
 0x1ce   :  { %361 = vrot.lane.b32.xlu0 %v335_v48, %s505_s15 }
 0x234   :  { %v342_v49 = vpop.permute.xlu0 %341 }
 0x236   :  { %v346_v50 = vpop.permute.xlu1 %345 }
 0x238   :  { %v338_v51 = vpop.permute.xlu0 %337 }
 0x239   :  { %v365_v52 = vsel %vm364_vm3, %v308_v39, %v338_v51 }
 0x23a   :  { %v366_v53 = vsel %vm41_vm0, %v365_v52, %v342_v49  ;;  %v350_v54 = vpop.permute.xlu1 %349 }
 0x23b   :  { %v368_v55 = vsel %vm367_vm4, %v366_v53, %v346_v50 }
 0x23c   :  { %v370_v56 = vsel %vm369_vm5, %v368_v55, %v350_v54  ;;  %v354_v57 = vpop.permute.xlu0 %353 }
 0x23d   :  { %v372_v58 = vsel %vm371_vm6, %v370_v56, %v354_v57 }
 0x23e   :  { %v358_v59 = vpop.permute.xlu1 %357 }
 0x23f   :  { %v374_v60 = vsel %vm373_vm7, %v372_v58, %v358_v59 }
 0x240   :  { %v362_v62 = vpop.permute.xlu0 %361 }
 0x241   :  { %v376_v63 = vsel %vm375_vm8, %v374_v60, %v362_v62 }
 0x242   :  { %v384_v1 = vmul.f32 %v414_v61, %v376_v63 }
 0x244   :  { %v392_v2 = vadd.f32 %v415_v0, %v384_v1 }
 0x246   :  { %v393_v3 = vmax.f32 %v392_v2, 0.0 }
 0x248   :  { %394 = vst [vmem:[#allocation2] sm:$0x3] %v393_v3 }
 0x249   :  { %482 = shalt.err (!%p479_p4)
}
 0x24a   :  { %s483_s24 = scalar_lea.hbm %s593_s6, 32 }
 0x24b   :  { %p484_p5 = scmp.ne.s32.totalorder %s593_s6, %s483_s24  ;;  %p487_p6 = scmp.lt.u32.totalorder %s483_s24, %s593_s6 }
 0x24d   :  { %p489_p7 = pnand %p487_p6, %p484_p5 }
 0x24f   :  { %492 = shalt.err (!%p489_p7)
}
 0x250   :  { %404 = dma.vmem_to_hbm [thread:$0]  %s402_s21, 32, %s593_s6, [#allocation3]  }
 0x251   :  { %493 = dma.done.wait [#allocation3], 32  }
 0x252   :  { %494 = vsyncadd [#allocation3], 4294967264 }
 0x253   :  { %408 = vsyncpa [#allocation3], 1 }

</bundles_post_ra>
